<compile_context>
chip_gen: v7x
topology: tpu7x:2x2x1
jax: 0.10.0
libtpu: 0.0.40
codegen_flags: <defaults>
</compile_context>

<pallas_src>
from functools import partial
import math

import jax
import jax.numpy as jnp
from jax.experimental import pallas as pl
from jax.experimental.pallas import tpu as pltpu


_LANE = 128


def _choose_tile(n_units, cap_units, align=1):
    """Pick (tile, padded_extent) in 'units'. Prefers a tile that divides the
    extent (no pad copy); otherwise pads up to a multiple of the cap."""
    cap_units = max(align, (cap_units // align) * align)
    if n_units <= cap_units:
        pad = -(-n_units // align) * align
        return pad, pad
    lo = max(cap_units // 2, align)
    for d in range(cap_units, lo - 1, -align):
        if n_units % d == 0:
            return d, n_units
    padded = -(-n_units // cap_units) * cap_units
    return cap_units, padded


# ----------------------------------------------------------------------------
# Path A: integer-label targets -> one-hot generated in-kernel.
# ----------------------------------------------------------------------------
def _gdice_label_kernel(x_ref, lab_ref, out_ref, acc_i, acc_s, *,
                        smooth, true_onehot_sum):
    n = pl.program_id(0)
    j = pl.program_id(1)

    @pl.when(jnp.logical_and(n == 0, j == 0))
    def _():
        acc_i[...] = jnp.zeros_like(acc_i)
        acc_s[...] = jnp.zeros_like(acc_s)

    x = x_ref[...].astype(jnp.float32)                       # (1, C, T)
    lab = lab_ref[...]                                       # (1, 1, T) int32
    cidx = jax.lax.broadcasted_iota(jnp.int32, x.shape, 1)   # channel index
    onehot = (cidx == lab).astype(jnp.float32)               # (1, C, T)

    # Lane-wise accumulation only (VPU); no per-step cross-lane reduce.
    acc_i[...] += x * onehot
    acc_s[...] += x

    @pl.when(jnp.logical_and(n == pl.num_programs(0) - 1,
                             j == pl.num_programs(1) - 1))
    def _():
        intersect = jnp.sum(acc_i[...])
        denom = jnp.sum(acc_s[...]) + true_onehot_sum     # sum(x) + sum(onehot)
        denom = jnp.maximum(denom, smooth)                # .clamp(min=smooth)
        out_ref[0, 0] = 1.0 - 2.0 * intersect / denom


def _gdice_from_labels(x, labels, smooth):
    N, C = x.shape[0], x.shape[1]
    spatial = math.prod(x.shape[2:])

    x3 = jnp.reshape(x, (N, C, spatial))                     # pure reshape
    lab3 = jnp.reshape(labels.astype(jnp.int32), (N, 1, spatial))

    # ~1 MiB of VMEM per x block (after sublane padding of C -> multiple of 8).
    sub_pad = ((C + 7) // 8) * 8
    cap_lanes = max(1, (1 << 20) // (sub_pad * 4 * _LANE))
    n_lanes = -(-spatial // _LANE)
    tile_lanes, pad_lanes = _choose_tile(n_lanes, cap_lanes, align=1)
    T = tile_lanes * _LANE
    spatial_pad = pad_lanes * _LANE

    if spatial_pad != spatial:
        x3 = jnp.pad(x3, ((0, 0), (0, 0), (0, spatial_pad - spatial)))
        lab3 = jnp.pad(lab3, ((0, 0), (0, 0), (0, spatial_pad - spatial)))

    grid = (N, spatial_pad // T)

    out = pl.pallas_call(
        partial(_gdice_label_kernel, smooth=float(smooth),
                true_onehot_sum=float(N * spatial)),
        out_shape=jax.ShapeDtypeStruct((1, 1), jnp.float32),
        grid_spec=pltpu.PrefetchScalarGridSpec(
            num_scalar_prefetch=0,
            grid=grid,
            in_specs=[
                pl.BlockSpec((1, C, T), lambda n, j: (n, 0, j)),
                pl.BlockSpec((1, 1, T), lambda n, j: (n, 0, j)),
            ],
            out_specs=pl.BlockSpec((1, 1), lambda n, j: (0, 0),
                                   memory_space=pltpu.SMEM),
            scratch_shapes=[
                pltpu.VMEM((1, C, T), jnp.float32),   # intersect accumulator
                pltpu.VMEM((1, C, T), jnp.float32),   # sum(x) accumulator
            ],
        ),
        compiler_params=pltpu.CompilerParams(
            dimension_semantics=("arbitrary", "arbitrary"),
            vmem_limit_bytes=32 * 1024 * 1024,
        ),
    )(x3, lab3)
    return out[0, 0]


# ----------------------------------------------------------------------------
# Path B: gt already has net_output's shape (one-hot / soft targets).
# ----------------------------------------------------------------------------
def _gdice_dense_kernel(x_ref, t_ref, out_ref, acc_i, acc_d, *, smooth):
    i = pl.program_id(0)

    @pl.when(i == 0)
    def _():
        acc_i[...] = jnp.zeros_like(acc_i)
        acc_d[...] = jnp.zeros_like(acc_d)

    x = x_ref[...].astype(jnp.float32)
    t = t_ref[...].astype(jnp.float32)
    acc_i[...] += x * t
    acc_d[...] += x + t

    @pl.when(i == pl.num_programs(0) - 1)
    def _():
        intersect = jnp.sum(acc_i[...])
        denom = jnp.maximum(jnp.sum(acc_d[...]), smooth)
        out_ref[0, 0] = 1.0 - 2.0 * intersect / denom


def _gdice_dense(x, t, smooth):
    total = math.prod(x.shape)
    n_rows = -(-total // _LANE)
    tile_rows, pad_rows = _choose_tile(n_rows, 2048, align=8)  # ~1 MiB/block
    total_pad = pad_rows * _LANE

    x1 = jnp.reshape(x, (-1,))
    t1 = jnp.reshape(t, (-1,))
    if total_pad != total:
        x1 = jnp.pad(x1, (0, total_pad - total))
        t1 = jnp.pad(t1, (0, total_pad - total))
    x2 = jnp.reshape(x1, (pad_rows, _LANE))
    t2 = jnp.reshape(t1, (pad_rows, _LANE))

    grid = (pad_rows // tile_rows,)

    out = pl.pallas_call(
        partial(_gdice_dense_kernel, smooth=float(smooth)),
        out_shape=jax.ShapeDtypeStruct((1, 1), jnp.float32),
        grid_spec=pltpu.PrefetchScalarGridSpec(
            num_scalar_prefetch=0,
            grid=grid,
            in_specs=[
                pl.BlockSpec((tile_rows, _LANE), lambda i: (i, 0)),
                pl.BlockSpec((tile_rows, _LANE), lambda i: (i, 0)),
            ],
            out_specs=pl.BlockSpec((1, 1), lambda i: (0, 0),
                                   memory_space=pltpu.SMEM),
            scratch_shapes=[
                pltpu.VMEM((tile_rows, _LANE), jnp.float32),
                pltpu.VMEM((tile_rows, _LANE), jnp.float32),
            ],
        ),
        compiler_params=pltpu.CompilerParams(
            dimension_semantics=("arbitrary",),
            vmem_limit_bytes=32 * 1024 * 1024,
        ),
    )(x2, t2)
    return out[0, 0]


# ----------------------------------------------------------------------------
# Public wrapper (matches GDiceLossV2.forward with default constructor args).
# ----------------------------------------------------------------------------
def gdice_loss_v2(net_output, gt, *, smooth=1e-5):
    """net_output: (N, C, ...) float logits/probs (apply_nonlin=None -> as-is).
    gt: either integer labels of shape (N, ...) / (N, 1, ...) or a float tensor
    with net_output's shape (used directly). Returns scalar float32 loss."""
    if gt.ndim != net_output.ndim:
        gt = jnp.reshape(gt, (gt.shape[0], 1) + gt.shape[1:])
    if gt.shape == net_output.shape:
        return _gdice_dense(net_output, gt, smooth)
    return _gdice_from_labels(net_output, gt, smooth)


# ----------------------------------------------------------------------------
# Pure-JAX reference (mirrors the torch module, default args).
# ----------------------------------------------------------------------------
def _reference(net_output, gt, smooth=1e-5):
    C = net_output.shape[1]
    if gt.ndim != net_output.ndim:
        gt = jnp.reshape(gt, (gt.shape[0], 1) + gt.shape[1:])
    if gt.shape == net_output.shape:
        y_onehot = gt
    else:
        labels = jnp.squeeze(gt.astype(jnp.int32), axis=1)
        y_onehot = jax.nn.one_hot(labels, C, axis=1, dtype=jnp.float32)
    my_in = jnp.reshape(jnp.moveaxis(net_output, 1, 0), (C, -1)).astype(jnp.float32)
    tgt = jnp.reshape(jnp.moveaxis(y_onehot, 1, 0), (C, -1)).astype(jnp.float32)
    intersect = jnp.sum((my_in * tgt).sum(-1))
    denom = jnp.maximum(jnp.sum((my_in + tgt).sum(-1)), smooth)
    return 1.0 - 2.0 * intersect / denom


if __name__ == "__main__":
    key = jax.random.PRNGKey(0)
    k1, k2, k3 = jax.random.split(key, 3)
    N, C, H, W = 2, 4, 16, 16
    net_output = jax.random.uniform(k1, (N, C, H, W), dtype=jnp.float32)

    # Integer-label targets (one-hot generated in-kernel).
    gt_labels = jax.random.randint(k2, (N, H, W), 0, C, dtype=jnp.int32)
    loss_lbl = jax.block_until_ready(gdice_loss_v2(net_output, gt_labels))
    ref_lbl = _reference(net_output, gt_labels)
    assert jnp.allclose(loss_lbl, ref_lbl, rtol=1e-5, atol=1e-6), (loss_lbl, ref_lbl)

    # Same-shape (soft / one-hot) targets -> dense path.
    gt_soft = jax.random.uniform(k3, (N, C, H, W), dtype=jnp.float32)
    loss_dense = jax.block_until_ready(gdice_loss_v2(net_output, gt_soft))
    ref_dense = _reference(net_output, gt_soft)
    assert jnp.allclose(loss_dense, ref_dense, rtol=1e-5, atol=1e-6), (loss_dense, ref_dense)

    print("KERNEL_OK")
</pallas_src>

<mosaic_0001>
module attributes {stable_mosaic.version = 11 : i64} {
  func.func @_gdice_label_kernel(%arg0: i32, %arg1: i32, %arg2: memref<1x4x256xf32, #tpu.memory_space<vmem>>, %arg3: memref<1x1x256xi32, #tpu.memory_space<vmem>>, %arg4: memref<1x1xf32, #tpu.memory_space<smem>>, %arg5: memref<1x4x256xf32, #tpu.memory_space<vmem>>, %arg6: memref<1x4x256xf32, #tpu.memory_space<vmem>>) attributes {dimension_semantics = [#tpu.dimension_semantics<arbitrary>, #tpu.dimension_semantics<arbitrary>], iteration_bounds = array<i64: 2, 1>, scalar_prefetch = 0 : i64, scratch_operands = 2 : i64, tpu.core_type = #tpu.core_type<tc>, window_params = [{transform_indices = @transform_0, window_bounds = array<i64: 1, 4, 256>}, {transform_indices = @transform_1, window_bounds = array<i64: 1, 1, 256>}, {transform_indices = @transform_2, window_bounds = array<i64: 1, 1>}]} {
    %c0_i32 = arith.constant 0 : i32
    %0 = arith.cmpi eq, %arg0, %c0_i32 : i32
    %c0_i32_0 = arith.constant 0 : i32
    %1 = arith.cmpi eq, %arg1, %c0_i32_0 : i32
    %2 = arith.andi %0, %1 : i1
    %3 = arith.extui %2 : i1 to i32
    %c0_i32_1 = arith.constant 0 : i32
    %4 = arith.cmpi ne, %3, %c0_i32_1 : i32
    scf.if %4 {
      %cst = arith.constant 0.000000e+00 : f32
      %24 = vector.broadcast %cst : f32 to vector<1x4x256xf32>
      %c0_21 = arith.constant 0 : index
      %c0_22 = arith.constant 0 : index
      %c0_23 = arith.constant 0 : index
      %25 = vector.load %arg5[%c0_21, %c0_22, %c0_23] : memref<1x4x256xf32, #tpu.memory_space<vmem>>, vector<1x4x256xf32>
      tpu.vector_store %arg5[%c0_21, %c0_22, %c0_23], %24 {strides = array<i32>} : memref<1x4x256xf32, #tpu.memory_space<vmem>>, vector<1x4x256xf32>,
      %cst_24 = arith.constant 0.000000e+00 : f32
      %26 = vector.broadcast %cst_24 : f32 to vector<1x4x256xf32>
      %c0_25 = arith.constant 0 : index
      %c0_26 = arith.constant 0 : index
      %c0_27 = arith.constant 0 : index
      %27 = vector.load %arg6[%c0_25, %c0_26, %c0_27] : memref<1x4x256xf32, #tpu.memory_space<vmem>>, vector<1x4x256xf32>
      tpu.vector_store %arg6[%c0_25, %c0_26, %c0_27], %26 {strides = array<i32>} : memref<1x4x256xf32, #tpu.memory_space<vmem>>, vector<1x4x256xf32>,
    } else {
    }
    %c0 = arith.constant 0 : index
    %c0_2 = arith.constant 0 : index
    %c0_3 = arith.constant 0 : index
    %5 = vector.load %arg2[%c0, %c0_2, %c0_3] : memref<1x4x256xf32, #tpu.memory_space<vmem>>, vector<1x4x256xf32>
    %c0_4 = arith.constant 0 : index
    %c0_5 = arith.constant 0 : index
    %c0_6 = arith.constant 0 : index
    %6 = vector.load %arg3[%c0_4, %c0_5, %c0_6] : memref<1x1x256xi32, #tpu.memory_space<vmem>>, vector<1x1x256xi32>
    %7 = tpu.iota {dimensions = array<i32: 1>} : vector<1x4x256xi32>
    %8 = vector.broadcast %6 : vector<1x1x256xi32> to vector<1x4x256xi32>
    %9 = arith.cmpi eq, %7, %8 : vector<1x4x256xi32>
    %10 = arith.extui %9 : vector<1x4x256xi1> to vector<1x4x256xi32>
    %11 = arith.sitofp %10 : vector<1x4x256xi32> to vector<1x4x256xf32>
    %c0_7 = arith.constant 0 : index
    %c0_8 = arith.constant 0 : index
    %c0_9 = arith.constant 0 : index
    %12 = vector.load %arg5[%c0_7, %c0_8, %c0_9] : memref<1x4x256xf32, #tpu.memory_space<vmem>>, vector<1x4x256xf32>
    %13 = arith.mulf %5, %11 : vector<1x4x256xf32>
    %14 = arith.addf %12, %13 : vector<1x4x256xf32>
    %c0_10 = arith.constant 0 : index
    %c0_11 = arith.constant 0 : index
    %c0_12 = arith.constant 0 : index
    %15 = vector.load %arg5[%c0_10, %c0_11, %c0_12] : memref<1x4x256xf32, #tpu.memory_space<vmem>>, vector<1x4x256xf32>
    tpu.vector_store %arg5[%c0_10, %c0_11, %c0_12], %14 {strides = array<i32>} : memref<1x4x256xf32, #tpu.memory_space<vmem>>, vector<1x4x256xf32>,
    %c0_13 = arith.constant 0 : index
    %c0_14 = arith.constant 0 : index
    %c0_15 = arith.constant 0 : index
    %16 = vector.load %arg6[%c0_13, %c0_14, %c0_15] : memref<1x4x256xf32, #tpu.memory_space<vmem>>, vector<1x4x256xf32>
    %17 = arith.addf %16, %5 : vector<1x4x256xf32>
    %c0_16 = arith.constant 0 : index
    %c0_17 = arith.constant 0 : index
    %c0_18 = arith.constant 0 : index
    %18 = vector.load %arg6[%c0_16, %c0_17, %c0_18] : memref<1x4x256xf32, #tpu.memory_space<vmem>>, vector<1x4x256xf32>
    tpu.vector_store %arg6[%c0_16, %c0_17, %c0_18], %17 {strides = array<i32>} : memref<1x4x256xf32, #tpu.memory_space<vmem>>, vector<1x4x256xf32>,
    %c1_i32 = arith.constant 1 : i32
    %19 = arith.cmpi eq, %arg0, %c1_i32 : i32
    %c0_i32_19 = arith.constant 0 : i32
    %20 = arith.cmpi eq, %arg1, %c0_i32_19 : i32
    %21 = arith.andi %19, %20 : i1
    %22 = arith.extui %21 : i1 to i32
    %c0_i32_20 = arith.constant 0 : i32
    %23 = arith.cmpi ne, %22, %c0_i32_20 : i32
    scf.if %23 {
      %c0_21 = arith.constant 0 : index
      %c0_22 = arith.constant 0 : index
      %c0_23 = arith.constant 0 : index
      %24 = vector.load %arg5[%c0_21, %c0_22, %c0_23] : memref<1x4x256xf32, #tpu.memory_space<vmem>>, vector<1x4x256xf32>
      %25 = vector.shape_cast %24 : vector<1x4x256xf32> to vector<1x1x4x256xf32>
      %cst = arith.constant dense<0.000000e+00> : vector<1xf32>
      %26 = vector.multi_reduction <add>, %25, %cst [1, 2, 3] : vector<1x1x4x256xf32> to vector<1xf32>
      %27 = vector.shape_cast %26 : vector<1xf32> to vector<1x1x1x1xf32>
      %28 = vector.extract %27[0, 0, 0, 0] : f32 from vector<1x1x1x1xf32>
      %c0_24 = arith.constant 0 : index
      %c0_25 = arith.constant 0 : index
      %c0_26 = arith.constant 0 : index
      %29 = vector.load %arg6[%c0_24, %c0_25, %c0_26] : memref<1x4x256xf32, #tpu.memory_space<vmem>>, vector<1x4x256xf32>
      %30 = vector.shape_cast %29 : vector<1x4x256xf32> to vector<1x1x4x256xf32>
      %cst_27 = arith.constant dense<0.000000e+00> : vector<1xf32>
      %31 = vector.multi_reduction <add>, %30, %cst_27 [1, 2, 3] : vector<1x1x4x256xf32> to vector<1xf32>
      %32 = vector.shape_cast %31 : vector<1xf32> to vector<1x1x1x1xf32>
      %33 = vector.extract %32[0, 0, 0, 0] : f32 from vector<1x1x1x1xf32>
      %cst_28 = arith.constant 5.120000e+02 : f32
      %34 = arith.addf %33, %cst_28 : f32
      %cst_29 = arith.constant 9.99999974E-6 : f32
      %35 = arith.maximumf %34, %cst_29 : f32
      %cst_30 = arith.constant 2.000000e+00 : f32
      %36 = arith.mulf %cst_30, %28 : f32
      %37 = arith.divf %36, %35 : f32
      %cst_31 = arith.constant 1.000000e+00 : f32
      %38 = arith.subf %cst_31, %37 : f32
      %c0_32 = arith.constant 0 : index
      %c0_33 = arith.constant 0 : index
      %39 = memref.load %arg4[%c0_32, %c0_33] : memref<1x1xf32, #tpu.memory_space<smem>>
      memref.store %38, %arg4[%c0_32, %c0_33] : memref<1x1xf32, #tpu.memory_space<smem>>
    } else {
    }
    return
  }
  func.func @transform_0(%arg0: i32, %arg1: i32) -> (i32, i32, i32) {
    %c0_i32 = arith.constant 0 : i32
    %c0_i32_0 = arith.constant 0 : i32
    return %arg0, %c0_i32, %arg1 : i32, i32, i32
  }
  func.func @transform_1(%arg0: i32, %arg1: i32) -> (i32, i32, i32) {
    %c0_i32 = arith.constant 0 : i32
    %c0_i32_0 = arith.constant 0 : i32
    return %arg0, %c0_i32, %arg1 : i32, i32, i32
  }
  func.func @transform_2(%arg0: i32, %arg1: i32) -> (i32, i32) {
    %c0_i32 = arith.constant 0 : i32
    %c0_i32_0 = arith.constant 0 : i32
    %c0_i32_1 = arith.constant 0 : i32
    return %c0_i32, %c0_i32_0 : i32, i32
  }
}

</mosaic_0001>

<bundles_post_ra>
// kernel: tpu_custom_call.1
= control target key start
LH: loop header
LB: loop body
LE: loop exit
PB: predicated region body
PF: predicated region fallthrough
CT: control target
= control target key end

     0   :  { %7 = vsyncpa [#allocation5], 0  ;;  %s825_s0 = inlined_call_operand.hbm [shape: f32[2,4,256], index: 0, kind: input, shape index: {}]   ;;  %s826_s1 = inlined_call_operand.hbm [shape: s32[2,1,256], index: 1, kind: input, shape index: {}]   ;;  %s827_s2 = inlined_call_operand.hbm [shape: f32[1,1], index: 2, kind: output, shape index: {}]  }
   0x1   :  { %9 = vsyncpa [#allocation5 + $0x1], 0 }
   0x2   :  { %10 = vsyncpa [#allocation8], 0 }
   0x3   :  { %12 = vsyncpa [#allocation8 + $0x1], 0 }
   0x4   :  { %13 = vsyncpa [#allocation6], 0  ;;  %s644_s9 = smov 0   ;;  %s646_s10 = smov 0  }
   0x5   :  { %s648_s11 = smov 0   ;;  %s650_s12 = smov 0  }
   0x6   :  { %s652_s13 = smov 0   ;;  %s654_s14 = smov 0  }
   0x7 LB: > { %s387_s15 = sadd.s32 4294967295, %s621_s14   ;;  %s31_s16 = sadd.s32 1, %s617_s13  ;;  %s621_s14 = sphi %s654_s14, %s19_s14   ;;  %s617_s13 = sphi %s652_s13, %s841_s13   ;;  %s613_s12 = sphi %s650_s12, %s840_s12   ;;  %s609_s11 = sphi %s648_s11, %s839_s11   ;;  %s605_s10 = sphi %s646_s10, %s838_s10   ;;  %s601_s9 = sphi %s644_s9, %s837_s9  }
   0x8   : > { %p33_p0 = scmp.ge.s32.totalorder %s31_s16, 2  ;;  %s40_s17 = sadd.s32 1, %s609_s11 }
   0x9   : > { %p47_p1 = scmp.ne.s32.totalorder %s609_s11, %s605_s10  ;;  %p48_p2 = scmp.eq.s32.totalorder %s621_s14, 0 }
   0xa   : > { %s843_s16 = smov (%p33_p0, %s31_s16), 0  ;;  %p53_p4 = scmp.ne.s32.totalorder %s605_s10, %s601_s9 }
   0xb   : > { %p680_p3 = por %p48_p2, %p47_p1  ;;  %s35_s19 = ssub.s32 %s617_s13, %s843_s16 }
   0xc   : > { %p54_p5 = scmp.eq.s32.totalorder %s387_s15, 0  ;;  %p38_p6 = scmp.eq.s32.totalorder %s35_s19, 0 }
   0xd   : > { %p432_p8 = scmp.lt.s32.totalorder %s621_s14, 2  ;;  %s698_s22 = sand.u32 1, %s609_s11  }
   0xe   : > { %p689_p7 = por %p54_p5, %p53_p4  ;;  %s407_s23 = sshll.u32 %s617_s13, 7 }
   0xf   : > { %s695_s21 = scalar_select %p38_p6, %s609_s11, %s40_s17  }
  0x10   : > { %s830_s20 = scalar_select %p689_p7, 1, 0 }
  0x11   : > { %s390_s24 = sshll.u32 %s698_s22, 3  ;;  %s705_s27 = scalar_lea.hbm %s825_s0, %s407_s23 }
  0x12   : > { %s130_s28 = scalar_lea.vmem [#allocation4], %s390_s24  ;;  %p709_p9 = pnand %p432_p8, %p680_p3 }
  0x13   : > { %s140_s29 = sshll.u32 %s130_s28, 4  ;;  %s127_s3 = scalar_lea.sflag [#allocation5], %s698_s22  ;;  %s713_s29 = int_to_ptr.vmem [resolvable:$true] %s140_s29 }
  0x14   : > { %s491_s4 = scalar_lea.hbm %s705_s27, 128  ;;  %p493_p13 = pneg %p709_p9 }
  0x15   : > { %p492_p12 = scmp.ne.s32.totalorder %s705_s27, %s491_s4  ;;  %s496_s7 = scalar_lea.hbm %s825_s0, 256 }
  0x16   : > { %p497_p2 = scmp.lt.u32.totalorder %s705_s27, %s825_s0  ;;  %p498_p3 = scmp.lt.u32.totalorder %s496_s7, %s491_s4 }
  0x17   : > { %p494_p0 = pnand %p493_p13, %p492_p12  ;;  %p500_p5 = scmp.lt.u32.totalorder %s491_s4, %s705_s27 }
  0x18   : > { %p499_p4 = por %p498_p3, %p497_p2 }
  0x19   : > { %p495_p1 = pneg %p494_p0 }
  0x1a   : > { %p501_p6 = por %p500_p5, %p499_p4 }
  0x1c   : > { %p502_p8 = pnand %p501_p6, %p495_p1 }
  0x1e   : > { %505 = shalt.err (!%p502_p8)
}
  0x1f   : > { %s506_s17 = scalar_lea.vmem %s713_s29, 128  ;;  %s623_s18 = smov [#allocation4]  }
  0x20   : > { %p507_p12 = scmp.ne.s32.totalorder %s713_s29, %s506_s17  ;;  %s511_s19 = sshll.u32 %s623_s18, 4  ;;  %s512_s19 = int_to_ptr.vmem [resolvable:$false] %s511_s19 }
  0x21   : > { %s513_s23 = scalar_lea.vmem %s512_s19, 256  ;;  %p514_p11 = scmp.lt.s32.totalorder %s713_s29, %s512_s19 }
  0x22   : > { %p509_p0 = pnand %p507_p12, %p493_p13  ;;  %p515_p2 = scmp.lt.s32.totalorder %s513_s23, %s506_s17 }
  0x24   : > { %p510_p10 = pneg %p509_p0  ;;  %p516_p3 = por %p515_p2, %p514_p11 }
  0x26   : > { %p517_p4 = pnand %p516_p3, %p510_p10 }
  0x28   : > { %520 = shalt.err (!%p517_p4)
}
  0x29   : > { %428 = dma.hbm_to_vmem [thread:$0]  (!%p709_p9), %s705_s27, 128, %s713_s29, %s127_s3  }
  0x2a   : > { %p832_p1 = scmp.lt.s32.totalorder %s621_s14, 3  ;;  %p833_p5 = scmp.ge.s32.totalorder %s621_s14, 1 }
  0x2b   : > { %s393_s25 = sshll.u32 %s698_s22, 1  ;;  %s408_s26 = sshll.u32 %s617_s13, 5 }
  0x2c   : > { %p747_p6 = pnand %p833_p5, %p832_p1  ;;  %s756_s5 = scalar_lea.hbm %s826_s1, %s408_s26 }
  0x2d   : > { %s151_s6 = scalar_lea.vmem [#allocation7], %s393_s25  ;;  %s148_s27 = scalar_lea.sflag [#allocation8], %s698_s22 }
  0x2e   : > { %s834_s24 = scalar_select %p747_p6, 1, 0 }
  0x2f   : > { %s161_s7 = sshll.u32 %s151_s6, 4  ;;  %s521_s29 = scalar_lea.hbm %s756_s5, 32  ;;  %s162_s7 = int_to_ptr.vmem [resolvable:$true] %s161_s7 }
  0x30   : > { %p522_p10 = scmp.ne.s32.totalorder %s756_s5, %s521_s29  ;;  %s526_s9 = scalar_lea.hbm %s826_s1, 64 }
  0x31   : > { %p527_p12 = scmp.lt.u32.totalorder %s756_s5, %s826_s1  ;;  %p528_p0 = scmp.lt.u32.totalorder %s526_s9, %s521_s29 }
  0x32   : > { %p524_p11 = pnand %p522_p10, %p493_p13  ;;  %p530_p3 = scmp.lt.u32.totalorder %s521_s29, %s756_s5 }
  0x33   : > { %p529_p2 = por %p528_p0, %p527_p12 }
  0x34   : > { %p525_p8 = pneg %p524_p11 }
  0x35   : > { %p531_p4 = por %p530_p3, %p529_p2 }
  0x37   : > { %p532_p1 = pnand %p531_p4, %p525_p8 }
  0x39   : > { %535 = shalt.err (!%p532_p1)
}
  0x3a   : > { %s536_s22 = scalar_lea.vmem %s162_s7, 32  ;;  %s624_s19 = smov [#allocation7]  }
  0x3b   : > { %p537_p5 = scmp.ne.s32.totalorder %s162_s7, %s536_s22  ;;  %s541_s23 = sshll.u32 %s624_s19, 4  ;;  %s542_s23 = int_to_ptr.vmem [resolvable:$false] %s541_s23 }
  0x3c   : > { %s543_s25 = scalar_lea.vmem %s542_s23, 64  ;;  %p544_p7 = scmp.lt.s32.totalorder %s162_s7, %s542_s23 }
  0x3d   : > { %p539_p10 = pnand %p537_p5, %p493_p13  ;;  %p545_p6 = scmp.lt.s32.totalorder %s543_s25, %s536_s22 }
  0x3f   : > { %p540_p11 = pneg %p539_p10  ;;  %p546_p0 = por %p545_p6, %p544_p7 }
  0x41   : > { %p547_p12 = pnand %p546_p0, %p540_p11 }
  0x43   : > { %550 = shalt.err (!%p547_p12)
}
  0x44   : > { %431 = dma.hbm_to_vmem [thread:$0]  (!%p709_p9), %s756_s5, 32, %s162_s7, %s148_s27  }
  0x45   : > { %p835_p8 = scmp.ne.s32.totalorder %s834_s24, 0 }
  0x46   : > { %s172_s26 = sand.u32 (!%p835_p8), 1, %s605_s10   ;;  %p836_p13 = scmp.ne.s32.totalorder (!%p835_p8), %s830_s20, 0 }
  0x47   : > { %170 = sbr.rel (%p835_p8) target bundleno = 413 (0x19d), region = 28  ;;  %s397_s28 = sshll.u32 (!%p835_p8), %s172_s26, 3 }
  0x48   : > { %s173_s4 = scalar_lea.sflag (!%p835_p8), [#allocation5], %s172_s26  ;;  %s176_s6 = scalar_lea.vmem (!%p835_p8), [#allocation4], %s397_s28 }
  0x4e   : > { %588 = dma.done.wait (%p836_p13), %s173_s4, 128  }
  0x4f   : > { %590 = vsyncadd (%p836_p13), %s173_s4, 4294967168  ;;  %s398_s29 = sshll.u32 %s172_s26, 1  ;;  %s182_s3 = scalar_lea.sflag [#allocation8], %s172_s26 }
  0x50   : > { %s185_s30 = scalar_lea.vmem [#allocation7], %s398_s29 }
  0x51   : > { %592 = dma.done.wait (%p836_p13), %s182_s3, 32  }
  0x52   : > { %594 = vsyncadd (%p836_p13), %s182_s3, 4294967264  ;;  %p208_p7 = scmp.eq.s32.totalorder %s613_s12, 0 }
  0x53   : > { %v625_v0 = vmov (%p208_p7), 0.0  }
  0x54   : > { %213 = sbr.rel (!%p208_p7) target bundleno = 91 (0x5b), region = 40  ;;  %214 = vst [vmem:[#allocation2] sm:$0xff] (%p208_p7), %v625_v0  ;;  %215 = vst [vmem:[#allocation3] sm:$0xff] (%p208_p7), %v625_v0 }
  0x5b PF: > { %v218_v1 = vlaneseq  ;;  %p245_p9 = scmp.eq.s32.totalorder %s613_s12, 1  ;;  %v216_v2 = vld [vmem:[%s176_s6] sm:$0xff]  ;;  %v242_v3 = vld [vmem:[#allocation3] sm:$0xff]  ;;  %v217_v6 = vld [vmem:[%s185_s30] sm:$0x3]  ;;  %v626_v11 = vmov 0.0  }
  0x5c   : > { %v243_v5 = vadd.f32 %v242_v3, %v216_v2  ;;  %v234_v15 = vld [vmem:[#allocation2] sm:$0xff]  ;;  %vm254_vm2 = vcmask (%p245_p9), 1043456   ;;  %s627_s5 = smov (%p245_p9), 1e-05  }
  0x5d   : > { %v219_v4 = vshrl.u32 %v218_v1, 7 }
  0x5e   : > { %244 = vst [vmem:[#allocation3] sm:$0xff] %v243_v5 }
  0x5f   : > { %v222_v7 = vsub.s32 0, %v219_v4  ;;  %v226_v8 = vsub.s32 1, %v219_v4 }
  0x61   : > { %v223_v9 = vrot.slane %v217_v6, %v222_v7  ;;  %v227_v10 = vrot.slane %v217_v6, %v226_v8 }
  0x63   : > { %vm228_vm0 = vcmp.eq.s32.totalorder %v219_v4, %v223_v9  ;;  %vm229_vm1 = vcmp.eq.s32.totalorder %v219_v4, %v227_v10 }
  0x64   : > { %v400_v12 = vsel %vm228_vm0, 1.0, %v626_v11  ;;  %v401_v13 = vsel %vm229_vm1, 1.0, %v626_v11 }
  0x65   : > { %v237_v14 = vcombine.low %v400_v12, %v401_v13  ;;  %249 = sbr.rel (!%p245_p9) target bundleno = 398 (0x18e), region = 44  ;;  %v267_v19 = vld [vmem:[#allocation3] sm:$0xff] (%p245_p9) }
  0x66   : > { %v269_v22 = vcombine.high (%p245_p9), %v267_v19, %v267_v19  ;;  %v271_v24 = vsel (%p245_p9), %vm254_vm2, %v267_v19, 0.0 }
  0x67   : > { %v239_v16 = vmul.f32 %v237_v14, %v216_v2 }
  0x68   : > { %v272_v25 = vsel (%p245_p9), %vm254_vm2, %v269_v22, 0.0 }
  0x69   : > { %v240_v17 = vadd.f32 %v239_v16, %v234_v15  ;;  %v273_v27 = vadd.f32 (%p245_p9), %v272_v25, %v271_v24 }
  0x6b   : > { %241 = vst [vmem:[#allocation2] sm:$0xff] %v240_v17 }
  0x72   : > { %v250_v18 = vld [vmem:[#allocation2] sm:$0xff] }
  0x73   : > { %v252_v20 = vcombine.high %v250_v18, %v250_v18  ;;  %v255_v21 = vsel %vm254_vm2, %v250_v18, 0.0 }
  0x75   : > { %v256_v23 = vsel %vm254_vm2, %v252_v20, 0.0 }
  0x76   : > { %v257_v26 = vadd.f32 %v256_v23, %v255_v21 }
  0x78   : > { %258 = vadd.xlane.f32.xlu0 %v257_v26 }
  0x7c   : > { %274 = vadd.xlane.f32.xlu0 %v273_v27 }
 0x105   : > { %v259_v28 = vpop.xlane.xlu0 %258 }
 0x106   : > { %v260_v29 = vrot.slane %v259_v28, 4 }
 0x108   : > { %v261_v30 = vadd.f32 %v260_v29, %v259_v28 }
 0x109   : > { %v275_v31 = vpop.xlane.xlu0 %274 }
 0x10a   : > { %v262_v32 = vrot.slane %v261_v30, 2  ;;  %v276_v33 = vrot.slane %v275_v31, 4 }
 0x10c   : > { %v277_v34 = vadd.f32 %v276_v33, %v275_v31  ;;  %v263_v35 = vadd.f32 %v262_v32, %v261_v30 }
 0x10e   : > { %v278_v36 = vrot.slane %v277_v34, 2  ;;  %v264_v37 = vrot.slane %v263_v35, 1 }
 0x110   : > { %v279_v38 = vadd.f32 %v278_v36, %v277_v34  ;;  %v265_v39 = vadd.f32 %v264_v37, %v263_v35 }
 0x112   : > { %411 = vpush %v265_v39  ;;  %v280_v40 = vrot.slane %v279_v38, 1 }
 0x114   : > { %v281_v41 = vadd.f32 %v280_v40, %v279_v38 }
 0x116   : > { %413 = vpush %v281_v41 }
 0x143   : > { %s412_s12 = spop %411 }
 0x144   : > { %s285_s27 = smul.f32 2.0, %s412_s12 }
 0x147   : > { %s414_s20 = spop %413 }
 0x148   : > { %s283_s24 = sadd.f32 512.0, %s414_s20 }
 0x14a   : > { %s284_s7 = smax.f32 %s627_s5, %s283_s24 }
 0x14b   : > { %v286_v42 = vstv %s284_s7 }
 0x14c   : > { %489 = vrcp.f32 %v286_v42 }
 0x156   : > { %v490_v43 = vpop.eup %489 }
 0x157   : > { %415 = vpush %v490_v43 }
 0x188   : > { %s416_s8 = spop %415 }
 0x189   : > { %s289_s9 = smul.f32 %s416_s8, %s285_s27 }
 0x18b   : > { %s290_s17 = ssub.f32 1.0, %s289_s9 }
 0x18d   : > { %292 = sst [smem:[#allocation9]] %s290_s17 }
 0x18e PF: > { %p433_p6 = scmp.eq.s32.totalorder %s387_s15, 1  ;;  %s551_s19 = scalar_lea.hbm %s827_s2, 16 }
 0x18f   : > { %p552_p2 = scmp.ne.s32.totalorder %s827_s2, %s551_s19  ;;  %p557_p1 = scmp.lt.u32.totalorder %s551_s19, %s827_s2 }
 0x191   : > { %p553_p3 = pnand %p552_p2, %p433_p6 }
 0x193   : > { %p554_p4 = pneg %p553_p3 }
 0x195   : > { %p559_p5 = pnand %p557_p1, %p554_p4 }
 0x197   : > { %562 = shalt.err (!%p559_p5)
}
 0x198   : > { %s628_s4 = smov [#allocation9]  }
 0x199   : > { %422 = dma.smem_to_hbm (%p433_p6), %s628_s4, 16, %s827_s2, [#allocation6]  }
 0x19a   : > { %596 = dma.done.wait (%p433_p6), [#allocation6], 16  }
 0x19b   : > { %598 = vsyncadd (%p433_p6), [#allocation6], 4294967280 }
 0x19c   : > { %306 = sfence }
 0x19d PF: > { %s19_s14 = sadd.s32 1, %s621_s14   ;;  %s837_s9 = smov %s605_s10 }
 0x19e   : > { %p16_p10 = scmp.ge.s32.totalorder %s19_s14, 4   ;;  %s838_s10 = smov %s609_s11 }
 0x19f   : > { %s839_s11 = smov %s695_s21  ;;  %s840_s12 = smov %s617_s13 }
 0x1a0   : > { %s841_s13 = smov %s843_s16  ;;  %18 = sbr.rel (!%p16_p10) target bundleno = 7 (0x7), region = 87 }
 0x1a7   :  { %312 = vsyncpa [#allocation5], 1 }
 0x1a8   :  { %314 = vsyncpa [#allocation5 + $0x1], 1 }
 0x1a9   :  { %315 = vsyncpa [#allocation8], 1 }
 0x1aa   :  { %317 = vsyncpa [#allocation8 + $0x1], 1 }
 0x1ab   :  { %318 = vsyncpa [#allocation6], 1 }
 0x1ac   :  { %320 = vsyncpa [#allocation6 + $0x1], 1 }

</bundles_post_ra>
